<compile_context>
chip_gen: v6e
topology: v6e:2x2x1
jax: 0.10.0
libtpu: 0.0.40
codegen_flags: <defaults>
</compile_context>

<pallas_src>
import math
import functools

import jax
import jax.numpy as jnp
from jax import lax
from jax.experimental import pallas as pl
from jax.experimental.pallas import tpu as pltpu

LN_EPS = 1e-12


def _round_up(a, b):
    return (a + b - 1) // b * b


def _lcm(a, b):
    return a * b // math.gcd(a, b)


def _layer_norm(x, gamma, beta, eps):
    """TF-style LayerNorm over the last dim, two-pass (centered) variance.

    x: (R, D) f32; gamma/beta: (1, D) f32.
    """
    mean = jnp.mean(x, axis=-1, keepdims=True)
    xc = x - mean
    var = jnp.mean(xc * xc, axis=-1, keepdims=True)   # biased variance, matches .mean()
    inv = lax.rsqrt(var + eps)                        # EUP rsqrt; no full-width divide
    return xc * (gamma * inv) + beta                  # gamma folded into the scale


def _mish(h):
    """mish(h) = h * tanh(softplus(h)) via tanh(log1p(e^h)) = y(y+2)/(y(y+2)+2)."""
    hc = jnp.minimum(h, 20.0)             # overflow clamp; tanh(softplus(20)) == 1 in f32
    y = jnp.exp(hc)                       # single EUP transcendental
    yy = y * (y + 2.0)
    den = yy + 2.0                        # always >= 2 -> well-conditioned reciprocal
    inv = pl.reciprocal(den, approx=True)
    inv = inv * (2.0 - den * inv)         # one Newton step -> ~f32 accurate (cheap VPU)
    return h * (yy * inv)


def embeddings_kernel(x_ref, g1_ref, b1_ref, w_ref, bl_ref, g2_ref, b2_ref,
                      pe_ref, out_ref, *, matmul_dtype):
    # x_ref block: (TILE_R, D_in) rows of the flattened (N*Lv, D_in) input.
    x = x_ref[...].astype(jnp.float32)

    # --- LayerNorm over the video-feature dim ---
    xn = _layer_norm(x, g1_ref[...], b1_ref[...], LN_EPS)

    # --- Dropout: identity in eval mode ---
    # TODO(synk): training-mode dropout (stateful PRNG mask) not implemented.

    # --- Linear D_in -> H on the MXU ---
    # Weight arrives from the wrapper already in the matmul dtype; only the
    # fresh activation is cast here (unavoidable, cheap).
    if matmul_dtype is not None and jnp.dtype(matmul_dtype) != jnp.dtype(jnp.float32):
        xn = xn.astype(matmul_dtype)
    h = jnp.dot(xn, w_ref[...], preferred_element_type=jnp.float32) + bl_ref[...]

    # --- Mish ---
    h = _mish(h)

    # --- LayerNorm over the hidden dim ---
    hn = _layer_norm(h, g2_ref[...], b2_ref[...], LN_EPS)

    # --- add positional encoding ---
    # pe_ref is a grid-invariant (TILE_R, H) slab; since TILE_R % Lv == 0 and
    # every tile starts at a row that is a multiple of Lv, block-row j always
    # corresponds to pe[j % Lv].
    out_ref[...] = (hn + pe_ref[...]).astype(out_ref.dtype)


def make_position_encoding(n_filters, max_len):
    position = jnp.arange(max_len, dtype=jnp.float32)[:, None]          # (L, 1)
    div_term = jnp.exp(jnp.arange(0, n_filters, 2, dtype=jnp.float32)
                       * (-math.log(10000.0) / n_filters))              # (H/2,)
    pe = jnp.zeros((max_len, n_filters), dtype=jnp.float32)
    pe = pe.at[:, 0::2].set(jnp.sin(position * div_term))
    pe = pe.at[:, 1::2].set(jnp.cos(position * div_term))
    return pe


def _pick_tile_rows(R, Lv, D_in, H, in_bytes, out_bytes, w_bytes, vmem_limit):
    """Pick a row-tile size: multiple of lcm(Lv, 8), sized to the VMEM budget,
    preferring an exact divisor of R (no ragged block) and >= 2 grid steps."""
    base = _lcm(Lv, 8)
    budget = int(vmem_limit * 0.7)
    fixed = 2 * D_in * H * w_bytes          # weight, worst-case double-buffered
    per_row = (2 * D_in * in_bytes          # input tile, double-buffered
               + 2 * H * out_bytes          # output tile, double-buffered
               + 2 * H * 4                  # PE slab (worst-case double-buffered)
               + 4 * max(D_in, H) * 4)      # f32 intermediates (x, xn, h, hn)
    cap = (budget - fixed) // max(per_row, 1)
    cap = min(max(cap, base), 1024)
    if R >= 2 * base:
        cap = min(cap, R // 2)              # >= 2 grid steps (v7x dual-TC sharding)
    cap = max(cap, base)

    best = None
    m = base
    while m <= min(R, cap):
        if R % m == 0:
            best = m
        m += base
    if best is not None:
        return best, R // best              # exact tiling, no padding / ragged block
    # Fallback: ragged last block, Pallas masks out-of-bounds rows on write.
    tile = min(_round_up(min(R, cap), base), _round_up(R, base))
    return tile, pl.cdiv(R, tile)


def bert_embeddings_video_untied(video_features, params, pe_full,
                                 *, matmul_dtype=None, out_dtype=None):
    """video_features: (N, Lv, D_in)  -> (N, Lv, H).

    matmul_dtype: set to jnp.bfloat16 at production scale (v5e/v6e/v7x) for
    higher MXU throughput + halved weight DMA; None keeps full f32 (required
    for the strict self-test tolerance). LN/Mish math stays f32 either way.
    out_dtype: override the output dtype (e.g. bf16 to halve the output HBM
    stream if downstream consumers accept it); defaults to the input dtype.
    """
    N, Lv, D_in = video_features.shape
    H = params["w"].shape[1]
    out_dtype = out_dtype or video_features.dtype
    mm_dtype = jnp.dtype(matmul_dtype) if matmul_dtype is not None else jnp.dtype(jnp.float32)

    # VMEM budget per generation (v5e/v6e: 128 MiB physical, v7x: 64 MiB).
    try:
        phys_vmem = pltpu.get_tpu_info().vmem_capacity_bytes
    except Exception:
        phys_vmem = 64 << 20
    vmem_limit = max(32 << 20, min(96 << 20, (phys_vmem * 3) // 5))

    R = N * Lv
    TILE_R, n_tiles = _pick_tile_rows(
        R, Lv, D_in, H,
        in_bytes=jnp.dtype(video_features.dtype).itemsize,
        out_bytes=jnp.dtype(out_dtype).itemsize,
        w_bytes=mm_dtype.itemsize,
        vmem_limit=vmem_limit)

    # Flatten batch*sequence into rows; no jnp.pad (no extra HBM copy).
    x_flat = video_features.reshape(R, D_in)

    # Grid-invariant PE slab: TILE_R % Lv == 0 so one (TILE_R, H) block serves
    # every row tile (row j of the slab holds pe[j % Lv]).
    pe_block = jnp.tile(pe_full[:Lv, :].astype(jnp.float32), (TILE_R // Lv, 1))

    # Params reshaped to >=2D for VMEM residency; weight cast once here.
    g1 = params["ln1_gamma"].reshape(1, D_in).astype(jnp.float32)
    b1 = params["ln1_beta"].reshape(1, D_in).astype(jnp.float32)
    w = params["w"].astype(mm_dtype)                                     # (D_in, H)
    bl = params["b"].reshape(1, H).astype(jnp.float32)
    g2 = params["ln2_gamma"].reshape(1, H).astype(jnp.float32)
    b2 = params["ln2_beta"].reshape(1, H).astype(jnp.float32)

    kernel = functools.partial(embeddings_kernel, matmul_dtype=matmul_dtype)

    def run(single_buffer_consts):
        if single_buffer_consts:
            # Grid-invariant blocks: no second buffer needed (frees VMEM).
            const = lambda shape: pl.BlockSpec(shape, lambda i: (0, 0),
                                               pipeline_mode=pl.Buffered(1))
        else:
            const = lambda shape: pl.BlockSpec(shape, lambda i: (0, 0))
        rowtile = lambda cols: pl.BlockSpec((TILE_R, cols), lambda i: (i, 0))

        return pl.pallas_call(
            kernel,
            out_shape=jax.ShapeDtypeStruct((R, H), out_dtype),
            grid_spec=pltpu.PrefetchScalarGridSpec(
                num_scalar_prefetch=0,
                grid=(n_tiles,),
                in_specs=[
                    rowtile(D_in),           # x rows (streamed, double-buffered)
                    const((1, D_in)),        # ln1 gamma
                    const((1, D_in)),        # ln1 beta
                    const((D_in, H)),        # linear weight (VMEM-resident)
                    const((1, H)),           # linear bias
                    const((1, H)),           # ln2 gamma
                    const((1, H)),           # ln2 beta
                    const((TILE_R, H)),      # positional-encoding slab
                ],
                out_specs=rowtile(H),
            ),
            compiler_params=pltpu.CompilerParams(
                # Row tiles are independent -> shard across TensorCores on v7x.
                dimension_semantics=("parallel",),
                vmem_limit_bytes=vmem_limit),
        )(x_flat, g1, b1, w, bl, g2, b2, pe_block)

    try:
        out_flat = run(True)
    except Exception:
        # TODO(synk): pipeline_mode=pl.Buffered(1) unsupported on this jax
        # build; fall back to default double-buffered constants.
        out_flat = run(False)

    return out_flat.reshape(N, Lv, H)


def reference_forward(video_features, params, pe_full):
    x = video_features.astype(jnp.float32)
    u = x.mean(-1, keepdims=True)
    s = ((x - u) ** 2).mean(-1, keepdims=True)
    x = (x - u) / jnp.sqrt(s + LN_EPS)
    x = params["ln1_gamma"] * x + params["ln1_beta"]
    h = x @ params["w"] + params["b"]
    h = h * jnp.tanh(jax.nn.softplus(h))
    u = h.mean(-1, keepdims=True)
    s = ((h - u) ** 2).mean(-1, keepdims=True)
    h = (h - u) / jnp.sqrt(s + LN_EPS)
    h = params["ln2_gamma"] * h + params["ln2_beta"]
    return h + pe_full[: video_features.shape[1], :][None]


if __name__ == "__main__":
    # small shapes consistent with the module's forward
    N, Lv = 2, 8
    D_in = 16          # config.video_feature_size
    H = 32             # config.hidden_size
    MAX_POS = 64       # config.max_position_embeddings

    key = jax.random.PRNGKey(0)
    k_x, k_w, k_b = jax.random.split(key, 3)

    video_features = jax.random.normal(k_x, (N, Lv, D_in), dtype=jnp.float32)

    params = {
        "ln1_gamma": jnp.ones((D_in,), jnp.float32),
        "ln1_beta": jnp.zeros((D_in,), jnp.float32),
        "w": jax.random.normal(k_w, (D_in, H), jnp.float32) * 0.02,
        "b": jax.random.normal(k_b, (H,), jnp.float32) * 0.02,
        "ln2_gamma": jnp.ones((H,), jnp.float32),
        "ln2_beta": jnp.zeros((H,), jnp.float32),
    }

    pe_full = make_position_encoding(H, MAX_POS)

    out = bert_embeddings_video_untied(video_features, params, pe_full)
    out = jax.block_until_ready(out)

    ref = reference_forward(video_features, params, pe_full)
    assert out.shape == (N, Lv, H)
    assert jnp.allclose(out, ref, atol=1e-5, rtol=1e-5), \
        f"max diff {jnp.max(jnp.abs(out - ref))}"

    print("KERNEL_OK")
</pallas_src>

<mosaic_0001>
module attributes {stable_mosaic.version = 11 : i64} {
  func.func @embeddings_kernel(%arg0: i32, %arg1: memref<8x16xf32, #tpu.memory_space<vmem>>, %arg2: memref<1x16xf32, #tpu.memory_space<vmem>>, %arg3: memref<1x16xf32, #tpu.memory_space<vmem>>, %arg4: memref<16x32xf32, #tpu.memory_space<vmem>>, %arg5: memref<1x32xf32, #tpu.memory_space<vmem>>, %arg6: memref<1x32xf32, #tpu.memory_space<vmem>>, %arg7: memref<1x32xf32, #tpu.memory_space<vmem>>, %arg8: memref<8x32xf32, #tpu.memory_space<vmem>>, %arg9: memref<8x32xf32, #tpu.memory_space<vmem>>) attributes {dimension_semantics = [#tpu.dimension_semantics<parallel>], iteration_bounds = array<i64: 2>, scalar_prefetch = 0 : i64, scratch_operands = 0 : i64, tpu.core_type = #tpu.core_type<tc>, window_params = [{transform_indices = @transform_0, window_bounds = array<i64: 8, 16>}, {pipeline_mode = #tpu.pipeline_mode<synchronous>, transform_indices = @transform_1, window_bounds = array<i64: 1, 16>}, {pipeline_mode = #tpu.pipeline_mode<synchronous>, transform_indices = @transform_2, window_bounds = array<i64: 1, 16>}, {pipeline_mode = #tpu.pipeline_mode<synchronous>, transform_indices = @transform_3, window_bounds = array<i64: 16, 32>}, {pipeline_mode = #tpu.pipeline_mode<synchronous>, transform_indices = @transform_4, window_bounds = array<i64: 1, 32>}, {pipeline_mode = #tpu.pipeline_mode<synchronous>, transform_indices = @transform_5, window_bounds = array<i64: 1, 32>}, {pipeline_mode = #tpu.pipeline_mode<synchronous>, transform_indices = @transform_6, window_bounds = array<i64: 1, 32>}, {pipeline_mode = #tpu.pipeline_mode<synchronous>, transform_indices = @transform_7, window_bounds = array<i64: 8, 32>}, {transform_indices = @transform_8, window_bounds = array<i64: 8, 32>}]} {
    %c0 = arith.constant 0 : index
    %c0_0 = arith.constant 0 : index
    %0 = vector.load %arg1[%c0, %c0_0] : memref<8x16xf32, #tpu.memory_space<vmem>>, vector<8x16xf32>
    %c0_1 = arith.constant 0 : index
    %c0_2 = arith.constant 0 : index
    %1 = vector.load %arg2[%c0_1, %c0_2] : memref<1x16xf32, #tpu.memory_space<vmem>>, vector<1x16xf32>
    %c0_3 = arith.constant 0 : index
    %c0_4 = arith.constant 0 : index
    %2 = vector.load %arg3[%c0_3, %c0_4] : memref<1x16xf32, #tpu.memory_space<vmem>>, vector<1x16xf32>
    %cst = arith.constant dense<0.000000e+00> : vector<8xf32>
    %3 = vector.multi_reduction <add>, %0, %cst [1] : vector<8x16xf32> to vector<8xf32>
    %4 = vector.shape_cast %3 : vector<8xf32> to vector<8x1xf32>
    %cst_5 = arith.constant 1.600000e+01 : f32
    %5 = vector.broadcast %cst_5 : f32 to vector<8x1xf32>
    %6 = arith.divf %4, %5 : vector<8x1xf32>
    %7 = vector.broadcast %6 : vector<8x1xf32> to vector<8x16xf32>
    %8 = arith.subf %0, %7 : vector<8x16xf32>
    %9 = arith.mulf %8, %8 : vector<8x16xf32>
    %cst_6 = arith.constant dense<0.000000e+00> : vector<8xf32>
    %10 = vector.multi_reduction <add>, %9, %cst_6 [1] : vector<8x16xf32> to vector<8xf32>
    %11 = vector.shape_cast %10 : vector<8xf32> to vector<8x1xf32>
    %cst_7 = arith.constant 1.600000e+01 : f32
    %12 = vector.broadcast %cst_7 : f32 to vector<8x1xf32>
    %13 = arith.divf %11, %12 : vector<8x1xf32>
    %cst_8 = arith.constant 9.99999996E-13 : f32
    %14 = vector.broadcast %cst_8 : f32 to vector<8x1xf32>
    %15 = arith.addf %13, %14 : vector<8x1xf32>
    %16 = math.rsqrt %15 : vector<8x1xf32>
    %17 = vector.broadcast %1 : vector<1x16xf32> to vector<8x16xf32>
    %18 = vector.broadcast %16 : vector<8x1xf32> to vector<8x16xf32>
    %19 = arith.mulf %17, %18 : vector<8x16xf32>
    %20 = arith.mulf %8, %19 : vector<8x16xf32>
    %21 = vector.broadcast %2 : vector<1x16xf32> to vector<8x16xf32>
    %22 = arith.addf %20, %21 : vector<8x16xf32>
    %c0_9 = arith.constant 0 : index
    %c0_10 = arith.constant 0 : index
    %23 = vector.load %arg4[%c0_9, %c0_10] : memref<16x32xf32, #tpu.memory_space<vmem>>, vector<16x32xf32>
    %cst_11 = arith.constant dense<0.000000e+00> : vector<8x32xf32>
    %24 = tpu.matmul %22, %23, %cst_11 {dimension_numbers = #tpu.dot_dimension_numbers<[1], [0], [0], [1], [0, 0, 1, 1], [], []>} : vector<8x16xf32>, vector<16x32xf32>, vector<8x32xf32> -> vector<8x32xf32>
    %c0_12 = arith.constant 0 : index
    %c0_13 = arith.constant 0 : index
    %25 = vector.load %arg5[%c0_12, %c0_13] : memref<1x32xf32, #tpu.memory_space<vmem>>, vector<1x32xf32>
    %26 = vector.broadcast %25 : vector<1x32xf32> to vector<8x32xf32>
    %27 = arith.addf %24, %26 : vector<8x32xf32>
    %cst_14 = arith.constant 2.000000e+01 : f32
    %28 = vector.broadcast %cst_14 : f32 to vector<8x32xf32>
    %29 = arith.minimumf %27, %28 : vector<8x32xf32>
    %30 = math.exp %29 : vector<8x32xf32>
    %cst_15 = arith.constant 2.000000e+00 : f32
    %31 = vector.broadcast %cst_15 : f32 to vector<8x32xf32>
    %32 = arith.addf %30, %31 : vector<8x32xf32>
    %33 = arith.mulf %30, %32 : vector<8x32xf32>
    %cst_16 = arith.constant 2.000000e+00 : f32
    %34 = vector.broadcast %cst_16 : f32 to vector<8x32xf32>
    %35 = arith.addf %33, %34 : vector<8x32xf32>
    %36 = tpu.reciprocal %35 {approx = true} : vector<8x32xf32> -> vector<8x32xf32>
    %37 = arith.mulf %35, %36 : vector<8x32xf32>
    %cst_17 = arith.constant 2.000000e+00 : f32
    %38 = vector.broadcast %cst_17 : f32 to vector<8x32xf32>
    %39 = arith.subf %38, %37 : vector<8x32xf32>
    %40 = arith.mulf %36, %39 : vector<8x32xf32>
    %41 = arith.mulf %33, %40 : vector<8x32xf32>
    %42 = arith.mulf %27, %41 : vector<8x32xf32>
    %c0_18 = arith.constant 0 : index
    %c0_19 = arith.constant 0 : index
    %43 = vector.load %arg6[%c0_18, %c0_19] : memref<1x32xf32, #tpu.memory_space<vmem>>, vector<1x32xf32>
    %c0_20 = arith.constant 0 : index
    %c0_21 = arith.constant 0 : index
    %44 = vector.load %arg7[%c0_20, %c0_21] : memref<1x32xf32, #tpu.memory_space<vmem>>, vector<1x32xf32>
    %cst_22 = arith.constant dense<0.000000e+00> : vector<8xf32>
    %45 = vector.multi_reduction <add>, %42, %cst_22 [1] : vector<8x32xf32> to vector<8xf32>
    %46 = vector.shape_cast %45 : vector<8xf32> to vector<8x1xf32>
    %cst_23 = arith.constant 3.200000e+01 : f32
    %47 = vector.broadcast %cst_23 : f32 to vector<8x1xf32>
    %48 = arith.divf %46, %47 : vector<8x1xf32>
    %49 = vector.broadcast %48 : vector<8x1xf32> to vector<8x32xf32>
    %50 = arith.subf %42, %49 : vector<8x32xf32>
    %51 = arith.mulf %50, %50 : vector<8x32xf32>
    %cst_24 = arith.constant dense<0.000000e+00> : vector<8xf32>
    %52 = vector.multi_reduction <add>, %51, %cst_24 [1] : vector<8x32xf32> to vector<8xf32>
    %53 = vector.shape_cast %52 : vector<8xf32> to vector<8x1xf32>
    %cst_25 = arith.constant 3.200000e+01 : f32
    %54 = vector.broadcast %cst_25 : f32 to vector<8x1xf32>
    %55 = arith.divf %53, %54 : vector<8x1xf32>
    %cst_26 = arith.constant 9.99999996E-13 : f32
    %56 = vector.broadcast %cst_26 : f32 to vector<8x1xf32>
    %57 = arith.addf %55, %56 : vector<8x1xf32>
    %58 = math.rsqrt %57 : vector<8x1xf32>
    %59 = vector.broadcast %43 : vector<1x32xf32> to vector<8x32xf32>
    %60 = vector.broadcast %58 : vector<8x1xf32> to vector<8x32xf32>
    %61 = arith.mulf %59, %60 : vector<8x32xf32>
    %62 = arith.mulf %50, %61 : vector<8x32xf32>
    %63 = vector.broadcast %44 : vector<1x32xf32> to vector<8x32xf32>
    %64 = arith.addf %62, %63 : vector<8x32xf32>
    %c0_27 = arith.constant 0 : index
    %c0_28 = arith.constant 0 : index
    %65 = vector.load %arg8[%c0_27, %c0_28] : memref<8x32xf32, #tpu.memory_space<vmem>>, vector<8x32xf32>
    %66 = arith.addf %64, %65 : vector<8x32xf32>
    %c0_29 = arith.constant 0 : index
    %c0_30 = arith.constant 0 : index
    %67 = vector.load %arg9[%c0_29, %c0_30] : memref<8x32xf32, #tpu.memory_space<vmem>>, vector<8x32xf32>
    tpu.vector_store %arg9[%c0_29, %c0_30], %66 {strides = array<i32>} : memref<8x32xf32, #tpu.memory_space<vmem>>, vector<8x32xf32>,
    return
  }
  func.func @transform_0(%arg0: i32) -> (i32, i32) {
    %c0_i32 = arith.constant 0 : i32
    %c0_i32_0 = arith.constant 0 : i32
    return %arg0, %c0_i32 : i32, i32
  }
  func.func @transform_1(%arg0: i32) -> (i32, i32) {
    %c0_i32 = arith.constant 0 : i32
    %c0_i32_0 = arith.constant 0 : i32
    %c0_i32_1 = arith.constant 0 : i32
    return %c0_i32, %c0_i32_0 : i32, i32
  }
  func.func @transform_2(%arg0: i32) -> (i32, i32) {
    %c0_i32 = arith.constant 0 : i32
    %c0_i32_0 = arith.constant 0 : i32
    %c0_i32_1 = arith.constant 0 : i32
    return %c0_i32, %c0_i32_0 : i32, i32
  }
  func.func @transform_3(%arg0: i32) -> (i32, i32) {
    %c0_i32 = arith.constant 0 : i32
    %c0_i32_0 = arith.constant 0 : i32
    %c0_i32_1 = arith.constant 0 : i32
    return %c0_i32, %c0_i32_0 : i32, i32
  }
  func.func @transform_4(%arg0: i32) -> (i32, i32) {
    %c0_i32 = arith.constant 0 : i32
    %c0_i32_0 = arith.constant 0 : i32
    %c0_i32_1 = arith.constant 0 : i32
    return %c0_i32, %c0_i32_0 : i32, i32
  }
  func.func @transform_5(%arg0: i32) -> (i32, i32) {
    %c0_i32 = arith.constant 0 : i32
    %c0_i32_0 = arith.constant 0 : i32
    %c0_i32_1 = arith.constant 0 : i32
    return %c0_i32, %c0_i32_0 : i32, i32
  }
  func.func @transform_6(%arg0: i32) -> (i32, i32) {
    %c0_i32 = arith.constant 0 : i32
    %c0_i32_0 = arith.constant 0 : i32
    %c0_i32_1 = arith.constant 0 : i32
    return %c0_i32, %c0_i32_0 : i32, i32
  }
  func.func @transform_7(%arg0: i32) -> (i32, i32) {
    %c0_i32 = arith.constant 0 : i32
    %c0_i32_0 = arith.constant 0 : i32
    %c0_i32_1 = arith.constant 0 : i32
    return %c0_i32, %c0_i32_0 : i32, i32
  }
  func.func @transform_8(%arg0: i32) -> (i32, i32) {
    %c0_i32 = arith.constant 0 : i32
    %c0_i32_0 = arith.constant 0 : i32
    return %arg0, %c0_i32 : i32, i32
  }
}

module attributes {stable_mosaic.version = 11 : i64} {
  func.func @embeddings_kernel(%arg0: i32, %arg1: memref<8x16xf32, #tpu.memory_space<vmem>>, %arg2: memref<1x16xf32, #tpu.memory_space<vmem>>, %arg3: memref<1x16xf32, #tpu.memory_space<vmem>>, %arg4: memref<16x32xf32, #tpu.memory_space<vmem>>, %arg5: memref<1x32xf32, #tpu.memory_space<vmem>>, %arg6: memref<1x32xf32, #tpu.memory_space<vmem>>, %arg7: memref<1x32xf32, #tpu.memory_space<vmem>>, %arg8: memref<8x32xf32, #tpu.memory_space<vmem>>, %arg9: memref<8x32xf32, #tpu.memory_space<vmem>>) attributes {dimension_semantics = [#tpu.dimension_semantics<parallel>], iteration_bounds = array<i64: 2>, scalar_prefetch = 0 : i64, scratch_operands = 0 : i64, tpu.core_type = #tpu.core_type<tc>, window_params = [{transform_indices = @transform_0, window_bounds = array<i64: 8, 16>}, {pipeline_mode = #tpu.pipeline_mode<synchronous>, transform_indices = @transform_1, window_bounds = array<i64: 1, 16>}, {pipeline_mode = #tpu.pipeline_mode<synchronous>, transform_indices = @transform_2, window_bounds = array<i64: 1, 16>}, {pipeline_mode = #tpu.pipeline_mode<synchronous>, transform_indices = @transform_3, window_bounds = array<i64: 16, 32>}, {pipeline_mode = #tpu.pipeline_mode<synchronous>, transform_indices = @transform_4, window_bounds = array<i64: 1, 32>}, {pipeline_mode = #tpu.pipeline_mode<synchronous>, transform_indices = @transform_5, window_bounds = array<i64: 1, 32>}, {pipeline_mode = #tpu.pipeline_mode<synchronous>, transform_indices = @transform_6, window_bounds = array<i64: 1, 32>}, {pipeline_mode = #tpu.pipeline_mode<synchronous>, transform_indices = @transform_7, window_bounds = array<i64: 8, 32>}, {transform_indices = @transform_8, window_bounds = array<i64: 8, 32>}]} {
    %c0 = arith.constant 0 : index
    %c0_0 = arith.constant 0 : index
    %0 = vector.load %arg1[%c0, %c0_0] : memref<8x16xf32, #tpu.memory_space<vmem>>, vector<8x16xf32>
    %c0_1 = arith.constant 0 : index
    %c0_2 = arith.constant 0 : index
    %1 = vector.load %arg2[%c0_1, %c0_2] : memref<1x16xf32, #tpu.memory_space<vmem>>, vector<1x16xf32>
    %c0_3 = arith.constant 0 : index
    %c0_4 = arith.constant 0 : index
    %2 = vector.load %arg3[%c0_3, %c0_4] : memref<1x16xf32, #tpu.memory_space<vmem>>, vector<1x16xf32>
    %cst = arith.constant dense<0.000000e+00> : vector<8xf32>
    %3 = vector.multi_reduction <add>, %0, %cst [1] : vector<8x16xf32> to vector<8xf32>
    %4 = vector.shape_cast %3 : vector<8xf32> to vector<8x1xf32>
    %cst_5 = arith.constant 1.600000e+01 : f32
    %5 = vector.broadcast %cst_5 : f32 to vector<8x1xf32>
    %6 = arith.divf %4, %5 : vector<8x1xf32>
    %7 = vector.broadcast %6 : vector<8x1xf32> to vector<8x16xf32>
    %8 = arith.subf %0, %7 : vector<8x16xf32>
    %9 = arith.mulf %8, %8 : vector<8x16xf32>
    %cst_6 = arith.constant dense<0.000000e+00> : vector<8xf32>
    %10 = vector.multi_reduction <add>, %9, %cst_6 [1] : vector<8x16xf32> to vector<8xf32>
    %11 = vector.shape_cast %10 : vector<8xf32> to vector<8x1xf32>
    %cst_7 = arith.constant 1.600000e+01 : f32
    %12 = vector.broadcast %cst_7 : f32 to vector<8x1xf32>
    %13 = arith.divf %11, %12 : vector<8x1xf32>
    %cst_8 = arith.constant 9.99999996E-13 : f32
    %14 = vector.broadcast %cst_8 : f32 to vector<8x1xf32>
    %15 = arith.addf %13, %14 : vector<8x1xf32>
    %16 = math.rsqrt %15 : vector<8x1xf32>
    %17 = vector.broadcast %1 : vector<1x16xf32> to vector<8x16xf32>
    %18 = vector.broadcast %16 : vector<8x1xf32> to vector<8x16xf32>
    %19 = arith.mulf %17, %18 : vector<8x16xf32>
    %20 = arith.mulf %8, %19 : vector<8x16xf32>
    %21 = vector.broadcast %2 : vector<1x16xf32> to vector<8x16xf32>
    %22 = arith.addf %20, %21 : vector<8x16xf32>
    %c0_9 = arith.constant 0 : index
    %c0_10 = arith.constant 0 : index
    %23 = vector.load %arg4[%c0_9, %c0_10] : memref<16x32xf32, #tpu.memory_space<vmem>>, vector<16x32xf32>
    %cst_11 = arith.constant dense<0.000000e+00> : vector<8x32xf32>
    %24 = tpu.matmul %22, %23, %cst_11 {dimension_numbers = #tpu.dot_dimension_numbers<[1], [0], [0], [1], [0, 0, 1, 1], [], []>} : vector<8x16xf32>, vector<16x32xf32>, vector<8x32xf32> -> vector<8x32xf32>
    %c0_12 = arith.constant 0 : index
    %c0_13 = arith.constant 0 : index
    %25 = vector.load %arg5[%c0_12, %c0_13] : memref<1x32xf32, #tpu.memory_space<vmem>>, vector<1x32xf32>
    %26 = vector.broadcast %25 : vector<1x32xf32> to vector<8x32xf32>
    %27 = arith.addf %24, %26 : vector<8x32xf32>
    %cst_14 = arith.constant 2.000000e+01 : f32
    %28 = vector.broadcast %cst_14 : f32 to vector<8x32xf32>
    %29 = arith.minimumf %27, %28 : vector<8x32xf32>
    %30 = math.exp %29 : vector<8x32xf32>
    %cst_15 = arith.constant 2.000000e+00 : f32
    %31 = vector.broadcast %cst_15 : f32 to vector<8x32xf32>
    %32 = arith.addf %30, %31 : vector<8x32xf32>
    %33 = arith.mulf %30, %32 : vector<8x32xf32>
    %cst_16 = arith.constant 2.000000e+00 : f32
    %34 = vector.broadcast %cst_16 : f32 to vector<8x32xf32>
    %35 = arith.addf %33, %34 : vector<8x32xf32>
    %36 = tpu.reciprocal %35 {approx = true} : vector<8x32xf32> -> vector<8x32xf32>
    %37 = arith.mulf %35, %36 : vector<8x32xf32>
    %cst_17 = arith.constant 2.000000e+00 : f32
    %38 = vector.broadcast %cst_17 : f32 to vector<8x32xf32>
    %39 = arith.subf %38, %37 : vector<8x32xf32>
    %40 = arith.mulf %36, %39 : vector<8x32xf32>
    %41 = arith.mulf %33, %40 : vector<8x32xf32>
    %42 = arith.mulf %27, %41 : vector<8x32xf32>
    %c0_18 = arith.constant 0 : index
    %c0_19 = arith.constant 0 : index
    %43 = vector.load %arg6[%c0_18, %c0_19] : memref<1x32xf32, #tpu.memory_space<vmem>>, vector<1x32xf32>
    %c0_20 = arith.constant 0 : index
    %c0_21 = arith.constant 0 : index
    %44 = vector.load %arg7[%c0_20, %c0_21] : memref<1x32xf32, #tpu.memory_space<vmem>>, vector<1x32xf32>
    %cst_22 = arith.constant dense<0.000000e+00> : vector<8xf32>
    %45 = vector.multi_reduction <add>, %42, %cst_22 [1] : vector<8x32xf32> to vector<8xf32>
    %46 = vector.shape_cast %45 : vector<8xf32> to vector<8x1xf32>
    %cst_23 = arith.constant 3.200000e+01 : f32
    %47 = vector.broadcast %cst_23 : f32 to vector<8x1xf32>
    %48 = arith.divf %46, %47 : vector<8x1xf32>
    %49 = vector.broadcast %48 : vector<8x1xf32> to vector<8x32xf32>
    %50 = arith.subf %42, %49 : vector<8x32xf32>
    %51 = arith.mulf %50, %50 : vector<8x32xf32>
    %cst_24 = arith.constant dense<0.000000e+00> : vector<8xf32>
    %52 = vector.multi_reduction <add>, %51, %cst_24 [1] : vector<8x32xf32> to vector<8xf32>
    %53 = vector.shape_cast %52 : vector<8xf32> to vector<8x1xf32>
    %cst_25 = arith.constant 3.200000e+01 : f32
    %54 = vector.broadcast %cst_25 : f32 to vector<8x1xf32>
    %55 = arith.divf %53, %54 : vector<8x1xf32>
    %cst_26 = arith.constant 9.99999996E-13 : f32
    %56 = vector.broadcast %cst_26 : f32 to vector<8x1xf32>
    %57 = arith.addf %55, %56 : vector<8x1xf32>
    %58 = math.rsqrt %57 : vector<8x1xf32>
    %59 = vector.broadcast %43 : vector<1x32xf32> to vector<8x32xf32>
    %60 = vector.broadcast %58 : vector<8x1xf32> to vector<8x32xf32>
    %61 = arith.mulf %59, %60 : vector<8x32xf32>
    %62 = arith.mulf %50, %61 : vector<8x32xf32>
    %63 = vector.broadcast %44 : vector<1x32xf32> to vector<8x32xf32>
    %64 = arith.addf %62, %63 : vector<8x32xf32>
    %c0_27 = arith.constant 0 : index
    %c0_28 = arith.constant 0 : index
    %65 = vector.load %arg8[%c0_27, %c0_28] : memref<8x32xf32, #tpu.memory_space<vmem>>, vector<8x32xf32>
    %66 = arith.addf %64, %65 : vector<8x32xf32>
    %c0_29 = arith.constant 0 : index
    %c0_30 = arith.constant 0 : index
    %67 = vector.load %arg9[%c0_29, %c0_30] : memref<8x32xf32, #tpu.memory_space<vmem>>, vector<8x32xf32>
    tpu.vector_store %arg9[%c0_29, %c0_30], %66 {strides = array<i32>} : memref<8x32xf32, #tpu.memory_space<vmem>>, vector<8x32xf32>,
    return
  }
  func.func @transform_0(%arg0: i32) -> (i32, i32) {
    %c0_i32 = arith.constant 0 : i32
    %c0_i32_0 = arith.constant 0 : i32
    return %arg0, %c0_i32 : i32, i32
  }
  func.func @transform_1(%arg0: i32) -> (i32, i32) {
    %c0_i32 = arith.constant 0 : i32
    %c0_i32_0 = arith.constant 0 : i32
    %c0_i32_1 = arith.constant 0 : i32
    return %c0_i32, %c0_i32_0 : i32, i32
  }
  func.func @transform_2(%arg0: i32) -> (i32, i32) {
    %c0_i32 = arith.constant 0 : i32
    %c0_i32_0 = arith.constant 0 : i32
    %c0_i32_1 = arith.constant 0 : i32
    return %c0_i32, %c0_i32_0 : i32, i32
  }
  func.func @transform_3(%arg0: i32) -> (i32, i32) {
    %c0_i32 = arith.constant 0 : i32
    %c0_i32_0 = arith.constant 0 : i32
    %c0_i32_1 = arith.constant 0 : i32
    return %c0_i32, %c0_i32_0 : i32, i32
  }
  func.func @transform_4(%arg0: i32) -> (i32, i32) {
    %c0_i32 = arith.constant 0 : i32
    %c0_i32_0 = arith.constant 0 : i32
    %c0_i32_1 = arith.constant 0 : i32
    return %c0_i32, %c0_i32_0 : i32, i32
  }
  func.func @transform_5(%arg0: i32) -> (i32, i32) {
    %c0_i32 = arith.constant 0 : i32
    %c0_i32_0 = arith.constant 0 : i32
    %c0_i32_1 = arith.constant 0 : i32
    return %c0_i32, %c0_i32_0 : i32, i32
  }
  func.func @transform_6(%arg0: i32) -> (i32, i32) {
    %c0_i32 = arith.constant 0 : i32
    %c0_i32_0 = arith.constant 0 : i32
    %c0_i32_1 = arith.constant 0 : i32
    return %c0_i32, %c0_i32_0 : i32, i32
  }
  func.func @transform_7(%arg0: i32) -> (i32, i32) {
    %c0_i32 = arith.constant 0 : i32
    %c0_i32_0 = arith.constant 0 : i32
    %c0_i32_1 = arith.constant 0 : i32
    return %c0_i32, %c0_i32_0 : i32, i32
  }
  func.func @transform_8(%arg0: i32) -> (i32, i32) {
    %c0_i32 = arith.constant 0 : i32
    %c0_i32_0 = arith.constant 0 : i32
    return %arg0, %c0_i32 : i32, i32
  }
}

</mosaic_0001>

<bundles_post_ra>
// kernel: tpu_custom_call.1
= control target key start
LH: loop header
LB: loop body
LE: loop exit
PB: predicated region body
PF: predicated region fallthrough
CT: control target
= control target key end

     0   :  { %s1115_s0 = inlined_call_operand.hbm [shape: f32[16,16], index: 0, kind: input, shape index: {}]   ;;  %s1116_s1 = inlined_call_operand.vmem [shape: f32[1,16], index: 1, kind: input, shape index: {}]   ;;  %s1117_s2 = inlined_call_operand.vmem [shape: f32[1,16], index: 2, kind: input, shape index: {}]   ;;  %s1118_s3 = inlined_call_operand.hbm [shape: f32[16,32], index: 3, kind: input, shape index: {}]   ;;  %s1119_s4 = inlined_call_operand.vmem [shape: f32[1,32], index: 4, kind: input, shape index: {}]   ;;  %s1120_s5 = inlined_call_operand.vmem [shape: f32[1,32], index: 5, kind: input, shape index: {}]   ;;  %s1121_s6 = inlined_call_operand.hbm [shape: f32[1,32], index: 6, kind: input, shape index: {}]   ;;  %s1122_s7 = inlined_call_operand.vmem [shape: f32[8,32], index: 7, kind: input, shape index: {}]   ;;  %s1123_s8 = inlined_call_operand.hbm [shape: f32[16,32], index: 8, kind: output, shape index: {}]  }
   0x1   :  { %1128 = sst [smem:[#allocation13_spill]] %s1118_s3 }
   0x2   :  { %1129 = sst [smem:[#allocation14_spill]] %s1121_s6 }
   0x3   :  { %13 = vsyncpa [#allocation3], 0 }
   0x4   :  { %15 = vsyncpa [#allocation3 + $0x1], 0 }
   0x5   :  { %16 = vsyncpa [#allocation6], 0 }
   0x6   :  { %17 = vsyncpa [#allocation4], 0 }
   0x7   :  { %19 = vsyncpa [#allocation4 + $0x1], 0  ;;  %s925_s27 = smov 0   ;;  %s927_s28 = smov 0  }
   0x8   :  { %s929_s29 = smov 0   ;;  %s931_s30 = smov 0  }
   0x9 LB: > { %s946_s9 = sadd.s32 4294967295, %s870_s30   ;;  %s611_s10 = sadd.s32 4294967294, %s870_s30   ;;  %s870_s30 = sphi %s931_s30, %s1151_s30   ;;  %s866_s29 = sphi %s929_s29, %s1150_s29   ;;  %s862_s28 = sphi %s927_s28, %s1149_s28   ;;  %s858_s27 = sphi %s925_s27, %s1148_s27  }
   0xa   : > { %p45_p0 = scmp.ne.s32.totalorder %s862_s28, %s858_s27  ;;  %p1124_p1 = scmp.eq.s32.totalorder %s946_s9, 0 }
   0xb   : > { %p222_p3 = scmp.eq.s32.totalorder %s611_s10, 1  ;;  %p612_p5 = scmp.ge.s32.totalorder %s870_s30, 1 }
   0xc   : > { %p955_p4 = por %p1124_p1, %p45_p0  ;;  %p229_p7 = scmp.lt.s32.totalorder %s870_s30, 3 }
   0xd   : > { %p960_p6 = por %p222_p3, %p45_p0  ;;  %s872_s14 = smov [#allocation5]  }
   0xe   : > { %s1130_s11 = scalar_select %p955_p4, 1, 0 }
   0xf   : > { %s1131_s12 = scalar_select %p960_p6, 1, 0 }
  0x10   : > { %p965_p8 = pnand %p612_p5, %p229_p7  ;;  %s247_s15 = sshll.u32 %s872_s14, 4  ;;  %s248_s15 = int_to_ptr.vmem [resolvable:$true] %s247_s15 }
  0x11   : > { %s873_s17 = smov [#allocation7]   ;;  %s733_s19 = scalar_lea.vmem %s248_s15, 256 }
  0x12   : > { %s1132_s13 = scalar_select %p965_p8, 1, 0 }
  0x13   : > { %p655_p9 = pneg %p965_p8  ;;  %s267_s18 = sshll.u32 %s873_s17, 4  ;;  %s268_s18 = int_to_ptr.vmem [resolvable:$true] %s267_s18 }
  0x14   : > { %p734_p13 = scmp.ne.s32.totalorder %s248_s15, %s733_s19  ;;  %p741_p5 = scmp.lt.s32.totalorder %s248_s15, %s248_s15 }
  0x15   : > { %p974_p11 = pnand %p655_p9, %p1124_p1  ;;  %p742_p7 = scmp.lt.s32.totalorder %s733_s19, %s733_s19 }
  0x17   : > { %p724_p12 = pneg %p974_p11  ;;  %p743_p10 = por %p742_p7, %p741_p5 }
  0x19   : > { %p736_p0 = pnand %p734_p13, %p724_p12 }
  0x1b   : > { %p737_p3 = pneg %p736_p0 }
  0x1d   : > { %p744_p9 = pnand %p743_p10, %p737_p3 }
  0x1f   : > { %747 = shalt.err (!%p744_p9)
}
  0x20   : > { %s874_s20 = smov 128   ;;  %s875_s21 = smov 8  }
  0x21   : > { %s1134_s3 = sld [smem:[#allocation13_spill]]  ;;  %s759_s24 = scalar_lea.vmem %s268_s18, 16 }
  0x22   : > { %p760_p1 = scmp.ne.s32.totalorder %s268_s18, %s759_s24  ;;  %s766_s25 = scalar_lea.vmem %s268_s18, 32 }
  0x23   : > { %p767_p2 = scmp.lt.s32.totalorder %s268_s18, %s268_s18  ;;  %p768_p5 = scmp.lt.s32.totalorder %s766_s25, %s759_s24 }
  0x24   : > { %p762_p13 = pnand %p760_p1, %p724_p12 }
  0x25   : > { %p769_p10 = por %p768_p5, %p767_p2 }
  0x26   : > { %p763_p0 = pneg %p762_p13 }
  0x27   : > { %658 = dma.hbm_to_vmem [thread:$0]  (!%p974_p11), %s1134_s3, 256, %s248_s15, [#allocation6], %s874_s20, %s874_s20, %s875_s21  }
  0x28   : > { %p770_p3 = pnand %p769_p10, %p763_p0 }
  0x2a   : > { %773 = shalt.err (!%p770_p3)
}
  0x2b   : > { %s1135_s6 = sld [smem:[#allocation14_spill]]  ;;  %s997_s14 = sadd.s32 1, %s870_s30  }
  0x2c   : > { %s32_s15 = sadd.s32 1, %s866_s29  ;;  %s29_s16 = ssub.s32 %s870_s30, %s997_s14 }
  0x2d   : > { %p39_p1 = scmp.ne.s32.totalorder %s866_s29, %s862_s28  ;;  %p30_p2 = scmp.eq.s32.totalorder %s29_s16, 0 }
  0x2e   : > { %p40_p12 = scmp.eq.s32.totalorder %s870_s30, 0  ;;  %p1136_p7 = scmp.eq.s32.totalorder %s946_s9, 1 }
  0x2f   : > { %p672_p13 = scmp.lt.s32.totalorder %s870_s30, 2  ;;  %s281_s20 = sand.u32 1, %s866_s29  }
  0x30   : > { %p1007_p9 = por %p1136_p7, %p39_p1  ;;  %p41_p0 = por %p40_p12, %p39_p1 }
  0x31   : > { %661 = dma.hbm_to_vmem [thread:$0]  (!%p974_p11), %s1135_s6, 16, %s268_s18, [#allocation6]  }
  0x32   : > { %s1137_s17 = scalar_select %p1007_p9, 1, 0 }
  0x33   : > { %s1013_s19 = scalar_select %p30_p2, %s866_s29, %s32_s15  }
  0x34   : > { %s616_s21 = sshll.u32 %s281_s20, 3  ;;  %s617_s18 = sshll.u32 %s870_s30, 7 }
  0x35   : > { %1138 = sst [smem:[#allocation12_spill]] %s1013_s19  ;;  %s1020_s24 = scalar_lea.hbm %s1115_s0, %s617_s18 }
  0x36   : > { %s285_s25 = scalar_lea.vmem [#allocation2], %s616_s21  ;;  %p1022_p11 = pnand %p672_p13, %p41_p0 }
  0x37   : > { %s292_s26 = sshll.u32 %s285_s25, 4  ;;  %s282_s15 = scalar_lea.sflag [#allocation3], %s281_s20  ;;  %s293_s26 = int_to_ptr.vmem [resolvable:$true] %s292_s26 }
  0x38   : > { %s774_s16 = scalar_lea.hbm %s1020_s24, 128  ;;  %p776_p10 = pneg %p1022_p11 }
  0x39   : > { %p775_p5 = scmp.ne.s32.totalorder %s1020_s24, %s774_s16  ;;  %s779_s23 = scalar_lea.hbm %s1115_s0, 256 }
  0x3a   : > { %p780_p2 = scmp.lt.s32.totalorder %s1020_s24, %s1115_s0  ;;  %p781_p12 = scmp.lt.s32.totalorder %s779_s23, %s774_s16 }
  0x3b   : > { %p777_p3 = pnand %p776_p10, %p775_p5 }
  0x3c   : > { %p782_p7 = por %p781_p12, %p780_p2 }
  0x3d   : > { %p778_p1 = pneg %p777_p3 }
  0x3f   : > { %p783_p13 = pnand %p782_p7, %p778_p1 }
  0x41   : > { %786 = shalt.err (!%p783_p13)
}
  0x42   : > { %s787_s25 = scalar_lea.vmem %s293_s26, 128  ;;  %s876_s20 = smov [#allocation2]  }
  0x43   : > { %p788_p0 = scmp.ne.s32.totalorder %s293_s26, %s787_s25  ;;  %s792_s6 = sshll.u32 %s876_s20, 4  ;;  %s793_s6 = int_to_ptr.vmem [resolvable:$false] %s792_s6 }
  0x44   : > { %s794_s19 = scalar_lea.vmem %s793_s6, 256  ;;  %p795_p5 = scmp.lt.s32.totalorder %s293_s26, %s793_s6 }
  0x45   : > { %p790_p6 = pnand %p788_p0, %p776_p10  ;;  %p796_p3 = scmp.lt.s32.totalorder %s794_s19, %s787_s25 }
  0x47   : > { %p791_p9 = pneg %p790_p6  ;;  %p797_p4 = por %p796_p3, %p795_p5 }
  0x49   : > { %p798_p8 = pnand %p797_p4, %p791_p9 }
  0x4b   : > { %801 = shalt.err (!%p798_p8)
}
  0x4c   : > { %665 = dma.hbm_to_vmem [thread:$0]  (!%p1022_p11), %s1020_s24, 128, %s293_s26, %s282_s15  }
  0x4d   : > { %p1140_p1 = scmp.ne.s32.totalorder %s1132_s13, 0 }
  0x4e   : > { %s1043_s3 = sand.u32 (!%p1140_p1), 1, %s862_s28   ;;  %p1141_p4 = scmp.ne.s32.totalorder (!%p1140_p1), %s1130_s11, 0 }
  0x4f   : > { %301 = sbr.rel (%p1140_p1) target bundleno = 963 (0x3c3), region = 52  ;;  %s619_s16 = sshll.u32 (!%p1140_p1), %s1043_s3, 3 }
  0x50   : > { %s304_s6 = scalar_lea.sflag (!%p1140_p1), [#allocation3], %s1043_s3  ;;  %s307_s19 = scalar_lea.vmem (!%p1140_p1), [#allocation2], %s619_s16 }
  0x54   : > { %845 = dma.done.wait (%p1141_p4), %s304_s6, 128  }
  0x55   : > { %847 = vsyncadd (%p1141_p4), %s304_s6, 4294967168  ;;  %p1142_p6 = scmp.eq.s32.totalorder %s946_s9, 0 }
  0x57   : > { %849 = dma.done.wait (%p1142_p6), [#allocation6], 272   ;;  %p1143_p8 = pmov %p1142_p6 }
  0x58   : > { %vm351_vm0 = vcmask 130048   ;;  %v348_v0 = vld [vmem:[%s307_s19] sm:$0xff]  ;;  %v381_v7 = vld [vmem:[#allocation5 + $0x8] sm:$0xff]  ;;  %v877_v8 = vmov 0.0   ;;  %v380_v9 = vld [vmem:[#allocation5] sm:$0xff]  ;;  %vm878_vm1 = vmmov 0  }
  0x59   : > { %851 = vsyncadd (%p1143_p8), [#allocation6], 4294967024  ;;  %v352_v1 = vsel %vm351_vm0, %v348_v0, 0.0  ;;  %636 = vmatprep.subr.mxu0 %v877_v8  ;;  %640 = vmatprep.mubr.msk.f32.mxu0 %vm878_vm1, %v877_v8  ;;  %v623_v13 = vld [vmem:[%s1116_s1] ss:$0 sm:$0xff]  ;;  %vm476_vm2 = vcmask 261120  }
  0x5a   : > { %353 = vadd.xlane.f32.xlu0 %v352_v1  ;;  %637 = vmatpush3.msra.mxu0 %v381_v7  ;;  %v624_v16 = vld [vmem:[%s1117_s2] ss:$0 sm:$0xff]  ;;  %s630_s25 = sshll.u32 %s946_s9, 7  ;;  %s347_s20 = scalar_lea.vmem [#allocation8], %s619_s16 }
  0x5b   : > { %638 = vmatprep.subr.mxu0 %v877_v8  ;;  %v625_v19 = vld [vmem:[%s1119_s4] ss:$0 sm:$0xff]  ;;  %s522_s6 = sshll.u32 %s347_s20, 4  ;;  %s520_s13 = scalar_lea.hbm %s1123_s8, %s630_s25  ;;  %s523_s6 = int_to_ptr.vmem [resolvable:$true] %s522_s6 }
  0x5c   : > { %639 = vmatpush3.msra.mxu0 %v380_v9  ;;  %v627_v44 = vld [vmem:[%s1120_s5] ss:$0 sm:$0xff]  ;;  %s509_s24 = scalar_lea.sflag [#allocation4], %s1043_s3  ;;  %s802_s26 = scalar_lea.vmem %s523_s6, 128 }
  0x5d   : > { %v628_v47 = vld [vmem:[#allocation7] ss:$0 sm:$0xff]  ;;  %p803_p9 = scmp.ne.s32.totalorder %s523_s6, %s802_s26  ;;  %p1144_p11 = scmp.ne.s32.totalorder %s1137_s17, 0 }
  0x5e   : > { %v505_v49 = vld [vmem:[%s1122_s7] sm:$0xff]  ;;  %s879_s10 = smov [#allocation8]  }
  0x5f   : > { %p804_p10 = pnand %p803_p9, %p1144_p11  ;;  %s806_s9 = sshll.u32 %s879_s10, 4  ;;  %s807_s9 = int_to_ptr.vmem [resolvable:$false] %s806_s9 }
  0x60   : > { %s808_s16 = scalar_lea.vmem %s807_s9, 256  ;;  %p809_p12 = scmp.lt.s32.totalorder %s523_s6, %s807_s9 }
  0x61   : > { %p805_p2 = pneg %p804_p10  ;;  %p810_p7 = scmp.lt.s32.totalorder %s808_s16, %s802_s26 }
  0x63   : > { %p811_p13 = por %p810_p7, %p809_p12 }
  0x65   : > { %p812_p0 = pnand %p811_p13, %p805_p2 }
  0xe3   : > { %v354_v2 = vpop.xlane.xlu0 %353 }
  0xe4   : > { %v356_v3 = vmul.f32 0.0625, %v354_v2 }
  0xe6   : > { %v357_v4 = vsub.f32 %v348_v0, %v356_v3 }
  0xe8   : > { %v358_v5 = vmul.f32 %v357_v4, %v357_v4 }
  0xea   : > { %v359_v6 = vsel %vm351_vm0, %v358_v5, 0.0 }
  0xeb   : > { %360 = vadd.xlane.f32.xlu0 %v359_v6 }
 0x174   : > { %v361_v10 = vpop.xlane.xlu0 %360 }
 0x175   : > { %v362_v11 = vmul.f32 0.0625, %v361_v10 }
 0x177   : > { %v363_v12 = vadd.f32 1e-12, %v362_v11 }
 0x179   : > { %714 = vrsqrt.f32 %v363_v12 }
 0x186   : > { %v715_v14 = vpop.eup %714 }
 0x187   : > { %v371_v15 = vmul.f32 %v715_v14, %v623_v13 }
 0x189   : > { %v372_v17 = vmul.f32 %v371_v15, %v357_v4 }
 0x18b   : > { %v379_v18 = vadd.f32 %v624_v16, %v372_v17 }
 0x18d   : > { %641 = vmatmul.mubr.msk.f32.vlgmr.msra.gmra.mxu0 %vm351_vm0, %v379_v18 }
 0x24d   : > { %v458_v20 = vpop.f32.mrf.mxu0 }
 0x24e   : > { %v459_v21 = vadd.f32 %v625_v19, %v458_v20 }
 0x24f   : > { %v642_v22 = vpop.f32.mrf.mxu0 }
 0x250   : > { %v462_v23 = vmin.f32 %v459_v21, 20.0 }
 0x252   : > { %v463_v24 = vmul.f32 1.442695, %v462_v23 }
 0x254   : > { %716 = vpow2.f32 %v463_v24 }
 0x261   : > { %v717_v25 = vpop.eup %716 }
 0x262   : > { %v465_v26 = vadd.f32 2.0, %v717_v25 }
 0x264   : > { %v466_v27 = vmul.f32 %v717_v25, %v465_v26 }
 0x266   : > { %v467_v28 = vadd.f32 2.0, %v466_v27 }
 0x268   : > { %718 = vrcp.f32 %v467_v28 }
 0x275   : > { %v719_v29 = vpop.eup %718 }
 0x276   : > { %v469_v30 = vmul.f32 %v719_v29, %v467_v28 }
 0x278   : > { %v470_v31 = vsub.f32 2.0, %v469_v30 }
 0x27a   : > { %v471_v32 = vmul.f32 %v719_v29, %v470_v31 }
 0x27c   : > { %v472_v33 = vmul.f32 %v471_v32, %v466_v27 }
 0x27e   : > { %v473_v34 = vmul.f32 %v472_v33, %v459_v21 }
 0x280   : > { %v477_v35 = vsel %vm476_vm2, %v473_v34, 0.0 }
 0x281   : > { %478 = vadd.xlane.f32.xlu1 %v477_v35 }
 0x30a   : > { %v479_v36 = vpop.xlane.xlu1 %478 }
 0x30b   : > { %v481_v37 = vmul.f32 0.03125, %v479_v36 }
 0x30d   : > { %v482_v38 = vsub.f32 %v473_v34, %v481_v37 }
 0x30f   : > { %v483_v39 = vmul.f32 %v482_v38, %v482_v38 }
 0x311   : > { %v484_v40 = vsel %vm476_vm2, %v483_v39, 0.0 }
 0x312   : > { %485 = vadd.xlane.f32.xlu1 %v484_v40 }
 0x39b   : > { %v486_v41 = vpop.xlane.xlu1 %485 }
 0x39c   : > { %v487_v42 = vmul.f32 0.03125, %v486_v41 }
 0x39e   : > { %v488_v43 = vadd.f32 1e-12, %v487_v42 }
 0x3a0   : > { %720 = vrsqrt.f32 %v488_v43 }
 0x3ad   : > { %v721_v45 = vpop.eup %720 }
 0x3ae   : > { %v496_v46 = vmul.f32 %v721_v45, %v627_v44 }
 0x3b0   : > { %v497_v48 = vmul.f32 %v496_v46, %v482_v38 }
 0x3b2   : > { %v504_v50 = vadd.f32 %v628_v47, %v497_v48 }
 0x3b4   : > { %v506_v51 = vadd.f32 %v505_v49, %v504_v50 }
 0x3b6   : > { %507 = vst.msk [vmem:[%s347_s20] sm:$0xff] %vm476_vm2, %v506_v51 }
 0x3b7   : > { %815 = shalt.err (!%p812_p0)
}
 0x3b8   : > { %s816_s15 = scalar_lea.hbm %s520_s13, 128  ;;  %s820_s22 = scalar_lea.hbm %s1123_s8, 256 }
 0x3b9   : > { %p817_p5 = scmp.ne.s32.totalorder %s520_s13, %s816_s15  ;;  %p821_p4 = scmp.lt.s32.totalorder %s520_s13, %s1123_s8 }
 0x3ba   : > { %p822_p6 = scmp.lt.s32.totalorder %s820_s22, %s816_s15 }
 0x3bb   : > { %p818_p3 = pnand %p817_p5, %p1144_p11 }
 0x3bc   : > { %p823_p8 = por %p822_p6, %p821_p4 }
 0x3bd   : > { %p819_p1 = pneg %p818_p3 }
 0x3bf   : > { %p824_p9 = pnand %p823_p8, %p819_p1 }
 0x3c1   : > { %827 = shalt.err (!%p824_p9)
}
 0x3c2   : > { %653 = dma.vmem_to_hbm [thread:$0]  (%p1144_p11), %s523_s6, 128, %s520_s13, %s509_s24  }
 0x3c3 PF: > { %s534_s25 = sand.u32 1, %s858_s27   ;;  %p1145_p10 = scmp.ne.s32.totalorder %s1131_s12, 0 }
 0x3c4   : > { %p1146_p2 = scmp.ge.s32.totalorder %s870_s30, 2  ;;  %s535_s20 = scalar_lea.sflag [#allocation4], %s534_s25 }
 0x3c6   : > { %p667_p12 = pnand %p1146_p2, %p1145_p10 }
 0x3c8   : > { %p668_p7 = pneg %p667_p12 }
 0x3ca   : > { %853 = dma.done.wait (%p668_p7), %s535_s20, 128  }
 0x3cb   : > { %855 = vsyncadd (%p668_p7), %s535_s20, 4294967168  ;;  %s1147_s19 = sld [smem:[#allocation12_spill]]  ;;  %p22_p13 = scmp.ge.s32.totalorder %s997_s14, 4  }
 0x3cc   : > { %s1148_s27 = smov %s862_s28  ;;  %s1149_s28 = smov %s866_s29 }
 0x3cd   : > { %s1151_s30 = smov %s997_s14  ;;  %24 = sbr.rel (!%p22_p13) target bundleno = 9 (0x9), region = 105 }
 0x3d1   : > { %s1150_s29 = smov %s1147_s19 }
 0x3d2   :  { %540 = vsyncpa [#allocation3], 1 }
 0x3d3   :  { %542 = vsyncpa [#allocation3 + $0x1], 1 }
 0x3d4   :  { %543 = vsyncpa [#allocation6], 1 }
 0x3d5   :  { %544 = vsyncpa [#allocation4], 1 }
 0x3d6   :  { %546 = vsyncpa [#allocation4 + $0x1], 1 }

// kernel: tpu_custom_call.1
= control target key start
LH: loop header
LB: loop body
LE: loop exit
PB: predicated region body
PF: predicated region fallthrough
CT: control target
= control target key end

     0   :  { %s1115_s0 = inlined_call_operand.hbm [shape: f32[16,16], index: 0, kind: input, shape index: {}]   ;;  %s1116_s1 = inlined_call_operand.vmem [shape: f32[1,16], index: 1, kind: input, shape index: {}]   ;;  %s1117_s2 = inlined_call_operand.vmem [shape: f32[1,16], index: 2, kind: input, shape index: {}]   ;;  %s1118_s3 = inlined_call_operand.hbm [shape: f32[16,32], index: 3, kind: input, shape index: {}]   ;;  %s1119_s4 = inlined_call_operand.vmem [shape: f32[1,32], index: 4, kind: input, shape index: {}]   ;;  %s1120_s5 = inlined_call_operand.vmem [shape: f32[1,32], index: 5, kind: input, shape index: {}]   ;;  %s1121_s6 = inlined_call_operand.hbm [shape: f32[1,32], index: 6, kind: input, shape index: {}]   ;;  %s1122_s7 = inlined_call_operand.vmem [shape: f32[8,32], index: 7, kind: input, shape index: {}]   ;;  %s1123_s8 = inlined_call_operand.hbm [shape: f32[16,32], index: 8, kind: output, shape index: {}]  }
   0x1   :  { %1128 = sst [smem:[#allocation13_spill]] %s1118_s3 }
   0x2   :  { %1129 = sst [smem:[#allocation14_spill]] %s1121_s6 }
   0x3   :  { %13 = vsyncpa [#allocation3], 0 }
   0x4   :  { %15 = vsyncpa [#allocation3 + $0x1], 0 }
   0x5   :  { %16 = vsyncpa [#allocation6], 0 }
   0x6   :  { %17 = vsyncpa [#allocation4], 0 }
   0x7   :  { %19 = vsyncpa [#allocation4 + $0x1], 0  ;;  %s925_s27 = smov 0   ;;  %s927_s28 = smov 0  }
   0x8   :  { %s929_s29 = smov 0   ;;  %s931_s30 = smov 0  }
   0x9 LB: > { %s946_s9 = sadd.s32 4294967295, %s870_s30   ;;  %s611_s10 = sadd.s32 4294967294, %s870_s30   ;;  %s870_s30 = sphi %s931_s30, %s1151_s30   ;;  %s866_s29 = sphi %s929_s29, %s1150_s29   ;;  %s862_s28 = sphi %s927_s28, %s1149_s28   ;;  %s858_s27 = sphi %s925_s27, %s1148_s27  }
   0xa   : > { %p45_p0 = scmp.ne.s32.totalorder %s862_s28, %s858_s27  ;;  %p1124_p1 = scmp.eq.s32.totalorder %s946_s9, 0 }
   0xb   : > { %p222_p3 = scmp.eq.s32.totalorder %s611_s10, 1  ;;  %p612_p5 = scmp.ge.s32.totalorder %s870_s30, 1 }
   0xc   : > { %p955_p4 = por %p1124_p1, %p45_p0  ;;  %p229_p7 = scmp.lt.s32.totalorder %s870_s30, 3 }
   0xd   : > { %p960_p6 = por %p222_p3, %p45_p0  ;;  %s872_s14 = smov [#allocation5]  }
   0xe   : > { %s1130_s11 = scalar_select %p955_p4, 1, 0 }
   0xf   : > { %s1131_s12 = scalar_select %p960_p6, 1, 0 }
  0x10   : > { %p965_p8 = pnand %p612_p5, %p229_p7  ;;  %s247_s15 = sshll.u32 %s872_s14, 4  ;;  %s248_s15 = int_to_ptr.vmem [resolvable:$true] %s247_s15 }
  0x11   : > { %s873_s17 = smov [#allocation7]   ;;  %s733_s19 = scalar_lea.vmem %s248_s15, 256 }
  0x12   : > { %s1132_s13 = scalar_select %p965_p8, 1, 0 }
  0x13   : > { %p655_p9 = pneg %p965_p8  ;;  %s267_s18 = sshll.u32 %s873_s17, 4  ;;  %s268_s18 = int_to_ptr.vmem [resolvable:$true] %s267_s18 }
  0x14   : > { %p734_p13 = scmp.ne.s32.totalorder %s248_s15, %s733_s19  ;;  %p741_p5 = scmp.lt.s32.totalorder %s248_s15, %s248_s15 }
  0x15   : > { %p974_p11 = pnand %p655_p9, %p1124_p1  ;;  %p742_p7 = scmp.lt.s32.totalorder %s733_s19, %s733_s19 }
  0x17   : > { %p724_p12 = pneg %p974_p11  ;;  %p743_p10 = por %p742_p7, %p741_p5 }
  0x19   : > { %p736_p0 = pnand %p734_p13, %p724_p12 }
  0x1b   : > { %p737_p3 = pneg %p736_p0 }
  0x1d   : > { %p744_p9 = pnand %p743_p10, %p737_p3 }
  0x1f   : > { %747 = shalt.err (!%p744_p9)
}
  0x20   : > { %s874_s20 = smov 128   ;;  %s875_s21 = smov 8  }
  0x21   : > { %s1134_s3 = sld [smem:[#allocation13_spill]]  ;;  %s759_s24 = scalar_lea.vmem %s268_s18, 16 }
  0x22   : > { %p760_p1 = scmp.ne.s32.totalorder %s268_s18, %s759_s24  ;;  %s766_s25 = scalar_lea.vmem %s268_s18, 32 }
  0x23   : > { %p767_p2 = scmp.lt.s32.totalorder %s268_s18, %s268_s18  ;;  %p768_p5 = scmp.lt.s32.totalorder %s766_s25, %s759_s24 }
  0x24   : > { %p762_p13 = pnand %p760_p1, %p724_p12 }
  0x25   : > { %p769_p10 = por %p768_p5, %p767_p2 }
  0x26   : > { %p763_p0 = pneg %p762_p13 }
  0x27   : > { %658 = dma.hbm_to_vmem [thread:$0]  (!%p974_p11), %s1134_s3, 256, %s248_s15, [#allocation6], %s874_s20, %s874_s20, %s875_s21  }
  0x28   : > { %p770_p3 = pnand %p769_p10, %p763_p0 }
  0x2a   : > { %773 = shalt.err (!%p770_p3)
}
  0x2b   : > { %s1135_s6 = sld [smem:[#allocation14_spill]]  ;;  %s997_s14 = sadd.s32 1, %s870_s30  }
  0x2c   : > { %s32_s15 = sadd.s32 1, %s866_s29  ;;  %s29_s16 = ssub.s32 %s870_s30, %s997_s14 }
  0x2d   : > { %p39_p1 = scmp.ne.s32.totalorder %s866_s29, %s862_s28  ;;  %p30_p2 = scmp.eq.s32.totalorder %s29_s16, 0 }
  0x2e   : > { %p40_p12 = scmp.eq.s32.totalorder %s870_s30, 0  ;;  %p1136_p7 = scmp.eq.s32.totalorder %s946_s9, 1 }
  0x2f   : > { %p672_p13 = scmp.lt.s32.totalorder %s870_s30, 2  ;;  %s281_s20 = sand.u32 1, %s866_s29  }
  0x30   : > { %p1007_p9 = por %p1136_p7, %p39_p1  ;;  %p41_p0 = por %p40_p12, %p39_p1 }
  0x31   : > { %661 = dma.hbm_to_vmem [thread:$0]  (!%p974_p11), %s1135_s6, 16, %s268_s18, [#allocation6]  }
  0x32   : > { %s1137_s17 = scalar_select %p1007_p9, 1, 0 }
  0x33   : > { %s1013_s19 = scalar_select %p30_p2, %s866_s29, %s32_s15  }
  0x34   : > { %s616_s21 = sshll.u32 %s281_s20, 3  ;;  %s617_s18 = sshll.u32 %s870_s30, 7 }
  0x35   : > { %1138 = sst [smem:[#allocation12_spill]] %s1013_s19  ;;  %s1020_s24 = scalar_lea.hbm %s1115_s0, %s617_s18 }
  0x36   : > { %s285_s25 = scalar_lea.vmem [#allocation2], %s616_s21  ;;  %p1022_p11 = pnand %p672_p13, %p41_p0 }
  0x37   : > { %s292_s26 = sshll.u32 %s285_s25, 4  ;;  %s282_s15 = scalar_lea.sflag [#allocation3], %s281_s20  ;;  %s293_s26 = int_to_ptr.vmem [resolvable:$true] %s292_s26 }
  0x38   : > { %s774_s16 = scalar_lea.hbm %s1020_s24, 128  ;;  %p776_p10 = pneg %p1022_p11 }
  0x39   : > { %p775_p5 = scmp.ne.s32.totalorder %s1020_s24, %s774_s16  ;;  %s779_s23 = scalar_lea.hbm %s1115_s0, 256 }
  0x3a   : > { %p780_p2 = scmp.lt.s32.totalorder %s1020_s24, %s1115_s0  ;;  %p781_p12 = scmp.lt.s32.totalorder %s779_s23, %s774_s16 }
  0x3b   : > { %p777_p3 = pnand %p776_p10, %p775_p5 }
  0x3c   : > { %p782_p7 = por %p781_p12, %p780_p2 }
  0x3d   : > { %p778_p1 = pneg %p777_p3 }
  0x3f   : > { %p783_p13 = pnand %p782_p7, %p778_p1 }
  0x41   : > { %786 = shalt.err (!%p783_p13)
}
  0x42   : > { %s787_s25 = scalar_lea.vmem %s293_s26, 128  ;;  %s876_s20 = smov [#allocation2]  }
  0x43   : > { %p788_p0 = scmp.ne.s32.totalorder %s293_s26, %s787_s25  ;;  %s792_s6 = sshll.u32 %s876_s20, 4  ;;  %s793_s6 = int_to_ptr.vmem [resolvable:$false] %s792_s6 }
  0x44   : > { %s794_s19 = scalar_lea.vmem %s793_s6, 256  ;;  %p795_p5 = scmp.lt.s32.totalorder %s293_s26, %s793_s6 }
  0x45   : > { %p790_p6 = pnand %p788_p0, %p776_p10  ;;  %p796_p3 = scmp.lt.s32.totalorder %s794_s19, %s787_s25 }
  0x47   : > { %p791_p9 = pneg %p790_p6  ;;  %p797_p4 = por %p796_p3, %p795_p5 }
  0x49   : > { %p798_p8 = pnand %p797_p4, %p791_p9 }
  0x4b   : > { %801 = shalt.err (!%p798_p8)
}
  0x4c   : > { %665 = dma.hbm_to_vmem [thread:$0]  (!%p1022_p11), %s1020_s24, 128, %s293_s26, %s282_s15  }
  0x4d   : > { %p1140_p1 = scmp.ne.s32.totalorder %s1132_s13, 0 }
  0x4e   : > { %s1043_s3 = sand.u32 (!%p1140_p1), 1, %s862_s28   ;;  %p1141_p4 = scmp.ne.s32.totalorder (!%p1140_p1), %s1130_s11, 0 }
  0x4f   : > { %301 = sbr.rel (%p1140_p1) target bundleno = 963 (0x3c3), region = 52  ;;  %s619_s16 = sshll.u32 (!%p1140_p1), %s1043_s3, 3 }
  0x50   : > { %s304_s6 = scalar_lea.sflag (!%p1140_p1), [#allocation3], %s1043_s3  ;;  %s307_s19 = scalar_lea.vmem (!%p1140_p1), [#allocation2], %s619_s16 }
  0x54   : > { %845 = dma.done.wait (%p1141_p4), %s304_s6, 128  }
  0x55   : > { %847 = vsyncadd (%p1141_p4), %s304_s6, 4294967168  ;;  %p1142_p6 = scmp.eq.s32.totalorder %s946_s9, 0 }
  0x57   : > { %849 = dma.done.wait (%p1142_p6), [#allocation6], 272   ;;  %p1143_p8 = pmov %p1142_p6 }
  0x58   : > { %vm351_vm0 = vcmask 130048   ;;  %v348_v0 = vld [vmem:[%s307_s19] sm:$0xff]  ;;  %v381_v7 = vld [vmem:[#allocation5 + $0x8] sm:$0xff]  ;;  %v877_v8 = vmov 0.0   ;;  %v380_v9 = vld [vmem:[#allocation5] sm:$0xff]  ;;  %vm878_vm1 = vmmov 0  }
  0x59   : > { %851 = vsyncadd (%p1143_p8), [#allocation6], 4294967024  ;;  %v352_v1 = vsel %vm351_vm0, %v348_v0, 0.0  ;;  %636 = vmatprep.subr.mxu0 %v877_v8  ;;  %640 = vmatprep.mubr.msk.f32.mxu0 %vm878_vm1, %v877_v8  ;;  %v623_v13 = vld [vmem:[%s1116_s1] ss:$0 sm:$0xff]  ;;  %vm476_vm2 = vcmask 261120  }
  0x5a   : > { %353 = vadd.xlane.f32.xlu0 %v352_v1  ;;  %637 = vmatpush3.msra.mxu0 %v381_v7  ;;  %v624_v16 = vld [vmem:[%s1117_s2] ss:$0 sm:$0xff]  ;;  %s630_s25 = sshll.u32 %s946_s9, 7  ;;  %s347_s20 = scalar_lea.vmem [#allocation8], %s619_s16 }
  0x5b   : > { %638 = vmatprep.subr.mxu0 %v877_v8  ;;  %v625_v19 = vld [vmem:[%s1119_s4] ss:$0 sm:$0xff]  ;;  %s522_s6 = sshll.u32 %s347_s20, 4  ;;  %s520_s13 = scalar_lea.hbm %s1123_s8, %s630_s25  ;;  %s523_s6 = int_to_ptr.vmem [resolvable:$true] %s522_s6 }
  0x5c   : > { %639 = vmatpush3.msra.mxu0 %v380_v9  ;;  %v627_v44 = vld [vmem:[%s1120_s5] ss:$0 sm:$0xff]  ;;  %s509_s24 = scalar_lea.sflag [#allocation4], %s1043_s3  ;;  %s802_s26 = scalar_lea.vmem %s523_s6, 128 }
  0x5d   : > { %v628_v47 = vld [vmem:[#allocation7] ss:$0 sm:$0xff]  ;;  %p803_p9 = scmp.ne.s32.totalorder %s523_s6, %s802_s26  ;;  %p1144_p11 = scmp.ne.s32.totalorder %s1137_s17, 0 }
  0x5e   : > { %v505_v49 = vld [vmem:[%s1122_s7] sm:$0xff]  ;;  %s879_s10 = smov [#allocation8]  }
  0x5f   : > { %p804_p10 = pnand %p803_p9, %p1144_p11  ;;  %s806_s9 = sshll.u32 %s879_s10, 4  ;;  %s807_s9 = int_to_ptr.vmem [resolvable:$false] %s806_s9 }
  0x60   : > { %s808_s16 = scalar_lea.vmem %s807_s9, 256  ;;  %p809_p12 = scmp.lt.s32.totalorder %s523_s6, %s807_s9 }
  0x61   : > { %p805_p2 = pneg %p804_p10  ;;  %p810_p7 = scmp.lt.s32.totalorder %s808_s16, %s802_s26 }
  0x63   : > { %p811_p13 = por %p810_p7, %p809_p12 }
  0x65   : > { %p812_p0 = pnand %p811_p13, %p805_p2 }
  0xe3   : > { %v354_v2 = vpop.xlane.xlu0 %353 }
  0xe4   : > { %v356_v3 = vmul.f32 0.0625, %v354_v2 }
  0xe6   : > { %v357_v4 = vsub.f32 %v348_v0, %v356_v3 }
  0xe8   : > { %v358_v5 = vmul.f32 %v357_v4, %v357_v4 }
  0xea   : > { %v359_v6 = vsel %vm351_vm0, %v358_v5, 0.0 }
  0xeb   : > { %360 = vadd.xlane.f32.xlu0 %v359_v6 }
 0x174   : > { %v361_v10 = vpop.xlane.xlu0 %360 }
 0x175   : > { %v362_v11 = vmul.f32 0.0625, %v361_v10 }
 0x177   : > { %v363_v12 = vadd.f32 1e-12, %v362_v11 }
 0x179   : > { %714 = vrsqrt.f32 %v363_v12 }
 0x186   : > { %v715_v14 = vpop.eup %714 }
 0x187   : > { %v371_v15 = vmul.f32 %v715_v14, %v623_v13 }
 0x189   : > { %v372_v17 = vmul.f32 %v371_v15, %v357_v4 }
 0x18b   : > { %v379_v18 = vadd.f32 %v624_v16, %v372_v17 }
 0x18d   : > { %641 = vmatmul.mubr.msk.f32.vlgmr.msra.gmra.mxu0 %vm351_vm0, %v379_v18 }
 0x24d   : > { %v458_v20 = vpop.f32.mrf.mxu0 }
 0x24e   : > { %v459_v21 = vadd.f32 %v625_v19, %v458_v20 }
 0x24f   : > { %v642_v22 = vpop.f32.mrf.mxu0 }
 0x250   : > { %v462_v23 = vmin.f32 %v459_v21, 20.0 }
 0x252   : > { %v463_v24 = vmul.f32 1.442695, %v462_v23 }
 0x254   : > { %716 = vpow2.f32 %v463_v24 }
 0x261   : > { %v717_v25 = vpop.eup %716 }
 0x262   : > { %v465_v26 = vadd.f32 2.0, %v717_v25 }
 0x264   : > { %v466_v27 = vmul.f32 %v717_v25, %v465_v26 }
 0x266   : > { %v467_v28 = vadd.f32 2.0, %v466_v27 }
 0x268   : > { %718 = vrcp.f32 %v467_v28 }
 0x275   : > { %v719_v29 = vpop.eup %718 }
 0x276   : > { %v469_v30 = vmul.f32 %v719_v29, %v467_v28 }
 0x278   : > { %v470_v31 = vsub.f32 2.0, %v469_v30 }
 0x27a   : > { %v471_v32 = vmul.f32 %v719_v29, %v470_v31 }
 0x27c   : > { %v472_v33 = vmul.f32 %v471_v32, %v466_v27 }
 0x27e   : > { %v473_v34 = vmul.f32 %v472_v33, %v459_v21 }
 0x280   : > { %v477_v35 = vsel %vm476_vm2, %v473_v34, 0.0 }
 0x281   : > { %478 = vadd.xlane.f32.xlu1 %v477_v35 }
 0x30a   : > { %v479_v36 = vpop.xlane.xlu1 %478 }
 0x30b   : > { %v481_v37 = vmul.f32 0.03125, %v479_v36 }
 0x30d   : > { %v482_v38 = vsub.f32 %v473_v34, %v481_v37 }
 0x30f   : > { %v483_v39 = vmul.f32 %v482_v38, %v482_v38 }
 0x311   : > { %v484_v40 = vsel %vm476_vm2, %v483_v39, 0.0 }
 0x312   : > { %485 = vadd.xlane.f32.xlu1 %v484_v40 }
 0x39b   : > { %v486_v41 = vpop.xlane.xlu1 %485 }
 0x39c   : > { %v487_v42 = vmul.f32 0.03125, %v486_v41 }
 0x39e   : > { %v488_v43 = vadd.f32 1e-12, %v487_v42 }
 0x3a0   : > { %720 = vrsqrt.f32 %v488_v43 }
 0x3ad   : > { %v721_v45 = vpop.eup %720 }
 0x3ae   : > { %v496_v46 = vmul.f32 %v721_v45, %v627_v44 }
 0x3b0   : > { %v497_v48 = vmul.f32 %v496_v46, %v482_v38 }
 0x3b2   : > { %v504_v50 = vadd.f32 %v628_v47, %v497_v48 }
 0x3b4   : > { %v506_v51 = vadd.f32 %v505_v49, %v504_v50 }
 0x3b6   : > { %507 = vst.msk [vmem:[%s347_s20] sm:$0xff] %vm476_vm2, %v506_v51 }
 0x3b7   : > { %815 = shalt.err (!%p812_p0)
}
 0x3b8   : > { %s816_s15 = scalar_lea.hbm %s520_s13, 128  ;;  %s820_s22 = scalar_lea.hbm %s1123_s8, 256 }
 0x3b9   : > { %p817_p5 = scmp.ne.s32.totalorder %s520_s13, %s816_s15  ;;  %p821_p4 = scmp.lt.s32.totalorder %s520_s13, %s1123_s8 }
 0x3ba   : > { %p822_p6 = scmp.lt.s32.totalorder %s820_s22, %s816_s15 }
 0x3bb   : > { %p818_p3 = pnand %p817_p5, %p1144_p11 }
 0x3bc   : > { %p823_p8 = por %p822_p6, %p821_p4 }
 0x3bd   : > { %p819_p1 = pneg %p818_p3 }
 0x3bf   : > { %p824_p9 = pnand %p823_p8, %p819_p1 }
 0x3c1   : > { %827 = shalt.err (!%p824_p9)
}
 0x3c2   : > { %653 = dma.vmem_to_hbm [thread:$0]  (%p1144_p11), %s523_s6, 128, %s520_s13, %s509_s24  }
 0x3c3 PF: > { %s534_s25 = sand.u32 1, %s858_s27   ;;  %p1145_p10 = scmp.ne.s32.totalorder %s1131_s12, 0 }
 0x3c4   : > { %p1146_p2 = scmp.ge.s32.totalorder %s870_s30, 2  ;;  %s535_s20 = scalar_lea.sflag [#allocation4], %s534_s25 }
 0x3c6   : > { %p667_p12 = pnand %p1146_p2, %p1145_p10 }
 0x3c8   : > { %p668_p7 = pneg %p667_p12 }
 0x3ca   : > { %853 = dma.done.wait (%p668_p7), %s535_s20, 128  }
 0x3cb   : > { %855 = vsyncadd (%p668_p7), %s535_s20, 4294967168  ;;  %s1147_s19 = sld [smem:[#allocation12_spill]]  ;;  %p22_p13 = scmp.ge.s32.totalorder %s997_s14, 4  }
 0x3cc   : > { %s1148_s27 = smov %s862_s28  ;;  %s1149_s28 = smov %s866_s29 }
 0x3cd   : > { %s1151_s30 = smov %s997_s14  ;;  %24 = sbr.rel (!%p22_p13) target bundleno = 9 (0x9), region = 105 }
 0x3d1   : > { %s1150_s29 = smov %s1147_s19 }
 0x3d2   :  { %540 = vsyncpa [#allocation3], 1 }
 0x3d3   :  { %542 = vsyncpa [#allocation3 + $0x1], 1 }
 0x3d4   :  { %543 = vsyncpa [#allocation6], 1 }
 0x3d5   :  { %544 = vsyncpa [#allocation4], 1 }
 0x3d6   :  { %546 = vsyncpa [#allocation4 + $0x1], 1 }

</bundles_post_ra>
